<compile_context>
chip_gen: v7x
topology: tpu7x:2x2x1
jax: 0.10.0
libtpu: 0.0.40
codegen_flags: <defaults>
</compile_context>

<pallas_src>
import jax
import jax.numpy as jnp
from jax.experimental import pallas as pl
from jax.experimental.pallas import tpu as pltpu

B = 2        # example batch size
L = 512      # input feature length fixed by the module docstring
C_OUT = 8    # out_channels
CL = C_OUT * L


def conv_img_local_kernel(w_ref, b_ref, x_ref, o_ref):
    """One lane-concat, one broadcast FMA, one unmasked full-tile store.

    w_ref: VMEM (1, 4096)   — w[c] repeated over each channel's 512-lane span
    b_ref: VMEM (1, 4096)   — bias[c] likewise
    x_ref: VMEM (TB, 512)   — dense batch block of the input (f32)
    o_ref: VMEM (TB, 4096)  — flattened NCW output block
    """
    x = x_ref[...]                                        # (TB, 512)
    # Lane-axis replication: (TB, 512) -> (TB, 4096); pure vreg copies, no XLU.
    x_rep = jnp.concatenate([x] * C_OUT, axis=-1)
    o_ref[...] = (x_rep * w_ref[...] + b_ref[...]).astype(o_ref.dtype)


def conv_img_local(x, weight, bias, *, tb=512, out_dtype=jnp.float32):
    """x: (B, 512); weight: (8, 1, 1) (PyTorch Conv1d layout); bias: (8,).

    Returns (B, 8, 512) in `out_dtype` (f32 default; pass jnp.bfloat16 to halve
    HBM writeback — math stays f32, only the store is cast).
    """
    bsz, length = x.shape
    assert length == L, f"expected feature length {L}, got {length}"

    # Avoid a spurious extra HBM pass when x is already f32.
    xf = x if x.dtype == jnp.float32 else x.astype(jnp.float32)

    # Batch tiling. Force >= 2 grid steps when possible (and keep the block a
    # multiple of 8 sublanes) so the "parallel" axis shards across both v7x TCs.
    tb = int(min(tb, bsz))
    if bsz <= tb and bsz >= 16:
        tb = max(8, (((bsz + 1) // 2) + 7) // 8 * 8)
    grid = (pl.cdiv(bsz, tb),)

    # Pre-broadcast parameters to full lane width once in the wrapper (tiny).
    w_flat = jnp.repeat(weight.reshape(C_OUT).astype(jnp.float32), L).reshape(1, CL)
    b_flat = jnp.repeat(bias.reshape(C_OUT).astype(jnp.float32), L).reshape(1, CL)

    out_bytes = jnp.dtype(out_dtype).itemsize
    block_bytes = tb * L * 4 + tb * CL * out_bytes + 2 * CL * 4
    # Double-buffered blocks + headroom; floor at 32 MiB (safe on all gens),
    # cap below v7x's 64 MiB physical per-TC VMEM.
    vmem_limit = int(min(max(2 * block_bytes + (2 << 20), 32 << 20), 56 << 20))

    cost = pl.CostEstimate(
        flops=2 * bsz * CL,
        transcendentals=0,
        bytes_accessed=bsz * L * 4 + bsz * CL * out_bytes + 2 * CL * 4,
    )

    out_flat = pl.pallas_call(
        conv_img_local_kernel,
        out_shape=jax.ShapeDtypeStruct((bsz, CL), out_dtype),
        grid=grid,
        in_specs=[
            pl.BlockSpec((1, CL), lambda i: (0, 0)),   # weights (constant)
            pl.BlockSpec((1, CL), lambda i: (0, 0)),   # bias    (constant)
            pl.BlockSpec((tb, L), lambda i: (i, 0)),   # x block (dense, unpadded)
        ],
        out_specs=pl.BlockSpec((tb, CL), lambda i: (i, 0)),
        compiler_params=pltpu.CompilerParams(
            dimension_semantics=("parallel",),   # megacore-shard batch on v7x
            vmem_limit_bytes=vmem_limit,
        ),
        cost_estimate=cost,
    )(w_flat, b_flat, xf)

    # (B, C_OUT*L) is byte-identical to row-major NCW (B, C_OUT, L).
    return out_flat.reshape(bsz, C_OUT, L)


if __name__ == "__main__":
    key = jax.random.PRNGKey(0)
    kx, kw, kb = jax.random.split(key, 3)

    # PyTorch-style init: uniform(-1/sqrt(fan_in), 1/sqrt(fan_in)), fan_in = 1*1.
    bound = 1.0
    weight = jax.random.uniform(kw, (C_OUT, 1, 1), jnp.float32, -bound, bound)
    bias = jax.random.uniform(kb, (C_OUT,), jnp.float32, -bound, bound)

    x = jax.random.normal(kx, (B, L), jnp.float32)

    # f32 path (matches the PyTorch module exactly).
    out = conv_img_local(x, weight, bias)
    out = jax.block_until_ready(out)
    assert out.shape == (B, C_OUT, L), out.shape

    # Pure-JAX reference of the kernel_size=1 conv.
    ref = weight[:, 0, 0][None, :, None] * x[:, None, :] + bias[None, :, None]
    assert jnp.allclose(out, ref, atol=1e-5, rtol=1e-5)

    # bf16-writeback path (f32 math, cast at store): ~half the HBM traffic.
    out_bf16 = conv_img_local(x, weight, bias, out_dtype=jnp.bfloat16)
    out_bf16 = jax.block_until_ready(out_bf16)
    assert out_bf16.dtype == jnp.bfloat16
    assert jnp.allclose(out_bf16.astype(jnp.float32), ref, atol=3e-2, rtol=3e-2)

    print("KERNEL_OK")
</pallas_src>

<mosaic_0001>
module attributes {stable_mosaic.version = 11 : i64} {
  func.func @conv_img_local_kernel(%arg0: i32, %arg1: memref<1x4096xf32, #tpu.memory_space<vmem>>, %arg2: memref<1x4096xf32, #tpu.memory_space<vmem>>, %arg3: memref<2x512xf32, #tpu.memory_space<vmem>>, %arg4: memref<2x4096xf32, #tpu.memory_space<vmem>>) attributes {dimension_semantics = [#tpu.dimension_semantics<parallel>], iteration_bounds = array<i64: 1>, scalar_prefetch = 0 : i64, scratch_operands = 0 : i64, tpu.core_type = #tpu.core_type<tc>, window_params = [{pipeline_mode = #tpu.pipeline_mode<synchronous>, transform_indices = @transform_0, window_bounds = array<i64: 1, 4096>}, {pipeline_mode = #tpu.pipeline_mode<synchronous>, transform_indices = @transform_1, window_bounds = array<i64: 1, 4096>}, {transform_indices = @transform_2, window_bounds = array<i64: 2, 512>}, {transform_indices = @transform_3, window_bounds = array<i64: 2, 4096>}]} {
    %c0 = arith.constant 0 : index
    %c0_0 = arith.constant 0 : index
    %0 = vector.load %arg3[%c0, %c0_0] : memref<2x512xf32, #tpu.memory_space<vmem>>, vector<2x512xf32>
    %1 = tpu.concatenate %0, %0, %0, %0, %0, %0, %0, %0 in 1 : vector<2x512xf32>, vector<2x512xf32>, vector<2x512xf32>, vector<2x512xf32>, vector<2x512xf32>, vector<2x512xf32>, vector<2x512xf32>, vector<2x512xf32> -> vector<2x4096xf32>
    %c0_1 = arith.constant 0 : index
    %c0_2 = arith.constant 0 : index
    %2 = vector.load %arg1[%c0_1, %c0_2] : memref<1x4096xf32, #tpu.memory_space<vmem>>, vector<1x4096xf32>
    %3 = vector.broadcast %2 : vector<1x4096xf32> to vector<2x4096xf32>
    %4 = arith.mulf %1, %3 : vector<2x4096xf32>
    %c0_3 = arith.constant 0 : index
    %c0_4 = arith.constant 0 : index
    %5 = vector.load %arg2[%c0_3, %c0_4] : memref<1x4096xf32, #tpu.memory_space<vmem>>, vector<1x4096xf32>
    %6 = vector.broadcast %5 : vector<1x4096xf32> to vector<2x4096xf32>
    %7 = arith.addf %4, %6 : vector<2x4096xf32>
    %c0_5 = arith.constant 0 : index
    %c0_6 = arith.constant 0 : index
    %8 = vector.load %arg4[%c0_5, %c0_6] : memref<2x4096xf32, #tpu.memory_space<vmem>>, vector<2x4096xf32>
    tpu.vector_store %arg4[%c0_5, %c0_6], %7 {strides = array<i32>} : memref<2x4096xf32, #tpu.memory_space<vmem>>, vector<2x4096xf32>,
    return
  }
  func.func @transform_0(%arg0: i32) -> (i32, i32) {
    %c0_i32 = arith.constant 0 : i32
    %c0_i32_0 = arith.constant 0 : i32
    %c0_i32_1 = arith.constant 0 : i32
    return %c0_i32, %c0_i32_0 : i32, i32
  }
  func.func @transform_1(%arg0: i32) -> (i32, i32) {
    %c0_i32 = arith.constant 0 : i32
    %c0_i32_0 = arith.constant 0 : i32
    %c0_i32_1 = arith.constant 0 : i32
    return %c0_i32, %c0_i32_0 : i32, i32
  }
  func.func @transform_2(%arg0: i32) -> (i32, i32) {
    %c0_i32 = arith.constant 0 : i32
    %c0_i32_0 = arith.constant 0 : i32
    return %arg0, %c0_i32 : i32, i32
  }
  func.func @transform_3(%arg0: i32) -> (i32, i32) {
    %c0_i32 = arith.constant 0 : i32
    %c0_i32_0 = arith.constant 0 : i32
    return %arg0, %c0_i32 : i32, i32
  }
}

</mosaic_0001>

<bundles_post_ra>
// kernel: tpu_custom_call.1
= control target key start
LH: loop header
LB: loop body
LE: loop exit
PB: predicated region body
PF: predicated region fallthrough
CT: control target
= control target key end

     0   :  { %8 = vsyncpa [#allocation3], 0  ;;  %s990_s0 = inlined_call_operand.hbm [shape: f32[1,4096], index: 0, kind: input, shape index: {}]   ;;  %s991_s1 = inlined_call_operand.hbm [shape: f32[1,4096], index: 1, kind: input, shape index: {}]   ;;  %s992_s2 = inlined_call_operand.hbm [shape: f32[2,512], index: 2, kind: input, shape index: {}]   ;;  %s993_s3 = inlined_call_operand.hbm [shape: f32[2,4096], index: 3, kind: output, shape index: {}]  }
   0x1   :  { %9 = vsyncpa [#allocation6], 0 }
   0x2   :  { %10 = vsyncpa [#allocation4], 0  ;;  %s773_s12 = smov [#allocation5]   ;;  %s774_s14 = smov [#allocation2]  }
   0x3   :  { %s27_s13 = sshll.u32 %s773_s12, 4  ;;  %s17_s15 = sshll.u32 %s774_s14, 4  ;;  %s28_s13 = int_to_ptr.vmem [resolvable:$true] %s27_s13  ;;  %s18_s15 = int_to_ptr.vmem [resolvable:$true] %s17_s15 }
   0x4   :  { %s679_s18 = scalar_lea.hbm %s991_s1, 512 }
   0x5   :  { %p680_p0 = scmp.ne.s32.totalorder %s991_s1, %s679_s18  ;;  %p683_p1 = scmp.lt.u32.totalorder %s679_s18, %s991_s1 }
   0x7   :  { %p685_p2 = pnand %p683_p1, %p680_p0 }
   0x9   :  { %688 = shalt.err (!%p685_p2)
}
   0xa   :  { %s689_s23 = scalar_lea.vmem %s28_s13, 512  ;;  %p694_p4 = scmp.lt.s32.totalorder %s28_s13, %s28_s13 }
   0xb   :  { %p690_p3 = scmp.ne.s32.totalorder %s28_s13, %s689_s23  ;;  %p695_p5 = scmp.lt.s32.totalorder %s689_s23, %s689_s23 }
   0xd   :  { %p696_p6 = por %p695_p5, %p694_p4 }
   0xf   :  { %p697_p7 = pnand %p696_p6, %p690_p3 }
  0x11   :  { %700 = shalt.err (!%p697_p7)
}
  0x12   :  { %30 = dma.hbm_to_vmem [thread:$0]  %s991_s1, 512, %s28_s13, [#allocation6]  }
  0x13   :  { %s701_s28 = scalar_lea.hbm %s990_s0, 512 }
  0x14   :  { %p702_p8 = scmp.ne.s32.totalorder %s990_s0, %s701_s28  ;;  %p705_p9 = scmp.lt.u32.totalorder %s701_s28, %s990_s0 }
  0x16   :  { %p707_p10 = pnand %p705_p9, %p702_p8 }
  0x18   :  { %710 = shalt.err (!%p707_p10)
}
  0x19   :  { %s711_s6 = scalar_lea.vmem %s18_s15, 512  ;;  %p716_p12 = scmp.lt.s32.totalorder %s18_s15, %s18_s15 }
  0x1a   :  { %p712_p11 = scmp.ne.s32.totalorder %s18_s15, %s711_s6  ;;  %p717_p13 = scmp.lt.s32.totalorder %s711_s6, %s711_s6 }
  0x1c   :  { %p718_p0 = por %p717_p13, %p716_p12 }
  0x1e   :  { %p719_p1 = pnand %p718_p0, %p712_p11 }
  0x20   :  { %722 = shalt.err (!%p719_p1)
}
  0x21   :  { %20 = dma.hbm_to_vmem [thread:$0]  %s990_s0, 512, %s18_s15, [#allocation3]  }
  0x22   :  { %s775_s8 = smov [#allocation7]   ;;  %s723_s12 = scalar_lea.hbm %s992_s2, 128 }
  0x23   :  { %s37_s9 = sshll.u32 %s775_s8, 4  ;;  %p724_p2 = scmp.ne.s32.totalorder %s992_s2, %s723_s12  ;;  %s38_s9 = int_to_ptr.vmem [resolvable:$true] %s37_s9 }
  0x24   :  { %p727_p3 = scmp.lt.u32.totalorder %s723_s12, %s992_s2 }
  0x26   :  { %p729_p4 = pnand %p727_p3, %p724_p2 }
  0x28   :  { %732 = shalt.err (!%p729_p4)
}
  0x29   :  { %s733_s18 = scalar_lea.vmem %s38_s9, 128  ;;  %p738_p6 = scmp.lt.s32.totalorder %s38_s9, %s38_s9 }
  0x2a   :  { %p734_p5 = scmp.ne.s32.totalorder %s38_s9, %s733_s18  ;;  %p739_p7 = scmp.lt.s32.totalorder %s733_s18, %s733_s18 }
  0x2c   :  { %p740_p8 = por %p739_p7, %p738_p6 }
  0x2e   :  { %p741_p9 = pnand %p740_p8, %p734_p5 }
  0x30   :  { %744 = shalt.err (!%p741_p9)
}
  0x31   :  { %40 = dma.hbm_to_vmem [thread:$0]  %s992_s2, 128, %s38_s9, [#allocation6]  }
  0x32   :  { %767 = dma.done.wait [#allocation3], 512  }
  0x33   :  { %768 = vsyncadd [#allocation3], 4294966784 }
  0x34   :  { %769 = dma.done.wait [#allocation6], 640  }
  0x35   :  { %770 = vsyncadd [#allocation6], 4294966656  ;;  %v56_v0 = vlaneseq  ;;  %v776_v1 = vmov 1983009808   ;;  %v50_v11 = vld [vmem:[#allocation7] sm:$0xff]  ;;  %v74_v41 = vld [vmem:[#allocation2 + $0x8] sm:$0xff] }
  0x36   :  { %v54_v2 = vunpack.c.l.s4 %v776_v1  ;;  %v73_v12 = vld [vmem:[#allocation2] sm:$0xff]  ;;  %v52_v17 = vcombine.high %v50_v11, %v50_v11  ;;  %v274_v58 = vld [vmem:[#allocation5 + $0x8] sm:$0xff]  ;;  %s777_s2 = smov [#allocation8]  }
  0x37   :  { %v57_v3 = vshrl.u32 %v56_v0, 7  ;;  %v273_v13 = vld [vmem:[#allocation5] sm:$0xff]  ;;  %s663_s19 = sshll.u32 %s777_s2, 4  ;;  %s664_s19 = int_to_ptr.vmem [resolvable:$true] %s663_s19 }
  0x38   :  { %v55_v4 = vunpack.c.0.s8 %v54_v2  ;;  %s745_s20 = scalar_lea.vmem %s664_s19, 1024  ;;  %p750_p11 = scmp.lt.s32.totalorder %s664_s19, %s664_s19 }
  0x39   :  { %v834_v5 = vsub.s32 0, %v57_v3  ;;  %v836_v6 = vsub.s32 1, %v57_v3  ;;  %v840_v8 = vsub.s32 2, %v57_v3  ;;  %v842_v9 = vsub.s32 3, %v57_v3  ;;  %p746_p10 = scmp.ne.s32.totalorder %s664_s19, %s745_s20  ;;  %p751_p12 = scmp.lt.s32.totalorder %s745_s20, %s745_s20 }
  0x3a   :  { %v838_v7 = vsub.s32 %v55_v4, %v57_v3  ;;  %v844_v10 = vsub.s32 4, %v57_v3  ;;  %v846_v14 = vsub.s32 5, %v57_v3  ;;  %v848_v15 = vsub.s32 6, %v57_v3 }
  0x3b   :  { %v850_v16 = vsub.s32 7, %v57_v3  ;;  %v84_v19 = vrot.slane %v73_v12, %v834_v5  ;;  %v88_v20 = vrot.slane %v73_v12, %v836_v6  ;;  %v92_v21 = vrot.slane %v73_v12, %v840_v8  ;;  %p752_p13 = por %p751_p12, %p750_p11 }
  0x3c   :  { %v853_v18 = vrot.slane %v50_v11, %v838_v7  ;;  %v96_v22 = vrot.slane %v73_v12, %v842_v9  ;;  %v284_v23 = vrot.slane %v273_v13, %v834_v5  ;;  %v288_v24 = vrot.slane %v273_v13, %v836_v6 }
  0x3d   :  { %v862_v25 = vrot.slane %v52_v17, %v838_v7  ;;  %v292_v28 = vrot.slane %v273_v13, %v840_v8  ;;  %v296_v29 = vrot.slane %v273_v13, %v842_v9  ;;  %v100_v30 = vrot.slane %v73_v12, %v844_v10  ;;  %p753_p0 = pnand %p752_p13, %p746_p10 }
  0x3e   :  { %v866_v26 = vcombine.high %v853_v18, %v853_v18  ;;  %v241_v27 = vmul.f32 %v84_v19, %v853_v18  ;;  %v104_v31 = vrot.slane %v73_v12, %v846_v14  ;;  %v108_v32 = vrot.slane %v73_v12, %v848_v15 }
  0x3f   :  { %v876_v33 = vcombine.high %v862_v25, %v862_v25  ;;  %v243_v35 = vmul.f32 %v92_v21, %v862_v25  ;;  %v112_v37 = vrot.slane %v73_v12, %v850_v16  ;;  %v245_v38 = vmul.f32 %v100_v30, %v853_v18 }
  0x40   :  { %v242_v34 = vmul.f32 %v88_v20, %v866_v26  ;;  %v441_v36 = vadd.f32 %v284_v23, %v241_v27  ;;  %v246_v39 = vmul.f32 %v104_v31, %v866_v26  ;;  %v247_v40 = vmul.f32 %v108_v32, %v862_v25 }
  0x41   :  { %v244_v42 = vmul.f32 %v96_v22, %v876_v33  ;;  %v443_v44 = vadd.f32 %v292_v28, %v243_v35  ;;  %v300_v45 = vrot.slane %v273_v13, %v844_v10  ;;  %v248_v46 = vmul.f32 %v112_v37, %v876_v33 }
  0x42   :  { %v442_v43 = vadd.f32 %v288_v24, %v242_v34  ;;  %v304_v47 = vrot.slane %v273_v13, %v846_v14  ;;  %v308_v48 = vrot.slane %v273_v13, %v848_v15  ;;  %v312_v49 = vrot.slane %v273_v13, %v850_v16 }
  0x43   :  { %v444_v50 = vadd.f32 %v296_v29, %v244_v42  ;;  %v445_v52 = vadd.f32 %v300_v45, %v245_v38  ;;  %v116_v53 = vrot.slane %v74_v41, %v834_v5  ;;  %v120_v57 = vrot.slane %v74_v41, %v836_v6 }
  0x44   :  { %v505_v51 = vcombine.low %v441_v36, %v442_v43  ;;  %v446_v54 = vadd.f32 %v304_v47, %v246_v39  ;;  %v447_v55 = vadd.f32 %v308_v48, %v247_v40  ;;  %v448_v56 = vadd.f32 %v312_v49, %v248_v46  ;;  %v75_v40 = vld [vmem:[#allocation2 + $0x10] sm:$0xff] }
  0x45   :  { %v506_v59 = vcombine.low %v443_v44, %v444_v50  ;;  %v124_v61 = vrot.slane %v74_v41, %v840_v8  ;;  %v128_v62 = vrot.slane %v74_v41, %v842_v9  ;;  %v249_v1 = vmul.f32 %v116_v53, %v853_v18  ;;  %v275_v49 = vld [vmem:[#allocation5 + $0x10] sm:$0xff] }
  0x46   :  { %v513_v60 = vrot.slane %v505_v51, %v838_v7  ;;  %v522_v63 = vcombine.low %v445_v52, %v446_v54  ;;  %v523_v0 = vcombine.low %v447_v55, %v448_v56  ;;  %v250_v2 = vmul.f32 %v120_v57, %v866_v26 }
  0x47   :  { %v520_v3 = vrot.slane %v506_v59, %v838_v7  ;;  %v251_v4 = vmul.f32 %v124_v61, %v862_v25  ;;  %v252_v11 = vmul.f32 %v128_v62, %v876_v33  ;;  %v316_v12 = vrot.slane %v274_v58, %v834_v5 }
  0x48   :  { %v530_v13 = vrot.slane %v522_v63, %v838_v7  ;;  %v537_v17 = vrot.slane %v523_v0, %v838_v7  ;;  %v320_v19 = vrot.slane %v274_v58, %v836_v6  ;;  %v324_v20 = vrot.slane %v274_v58, %v840_v8 }
  0x49   :  { %v521_v21 = vcombine.low %v513_v60, %v520_v3  ;;  %v328_v22 = vrot.slane %v274_v58, %v842_v9  ;;  %v449_v23 = vadd.f32 %v316_v12, %v249_v1  ;;  %v132_v24 = vrot.slane %v74_v41, %v844_v10 }
  0x4a   :  { %v538_v27 = vcombine.low %v530_v13, %v537_v17  ;;  %v450_v28 = vadd.f32 %v320_v19, %v250_v2  ;;  %v451_v29 = vadd.f32 %v324_v20, %v251_v4  ;;  %v136_v30 = vrot.slane %v74_v41, %v846_v14 }
  0x4b   :  { %649 = vst [vmem:[#allocation8] sm:$0xff] %v521_v21  ;;  %v452_v31 = vadd.f32 %v328_v22, %v252_v11  ;;  %v140_v32 = vrot.slane %v74_v41, %v848_v15  ;;  %v144_v34 = vrot.slane %v74_v41, %v850_v16  ;;  %v253_v35 = vmul.f32 %v132_v24, %v853_v18  ;;  %v76_v24 = vld [vmem:[#allocation2 + $0x18] sm:$0xff] }
  0x4c   :  { %650 = vst [vmem:[#allocation8 + $0x8] sm:$0xff] %v538_v27  ;;  %v539_v36 = vcombine.low %v449_v23, %v450_v28  ;;  %v254_v37 = vmul.f32 %v136_v30, %v866_v26  ;;  %v332_v38 = vrot.slane %v274_v58, %v844_v10  ;;  %v336_v39 = vrot.slane %v274_v58, %v846_v14 }
  0x4d   :  { %v540_v42 = vcombine.low %v451_v29, %v452_v31  ;;  %v255_v43 = vmul.f32 %v140_v32, %v862_v25  ;;  %v256_v44 = vmul.f32 %v144_v34, %v876_v33  ;;  %v340_v45 = vrot.slane %v274_v58, %v848_v15 }
  0x4e   :  { %v547_v41 = vrot.slane %v539_v36, %v838_v7  ;;  %v344_v46 = vrot.slane %v274_v58, %v850_v16  ;;  %v453_v47 = vadd.f32 %v332_v38, %v253_v35  ;;  %v454_v48 = vadd.f32 %v336_v39, %v254_v37 }
  0x4f   :  { %v554_v50 = vrot.slane %v540_v42, %v838_v7  ;;  %v455_v51 = vadd.f32 %v340_v45, %v255_v43  ;;  %v148_v52 = vrot.slane %v75_v40, %v834_v5  ;;  %v152_v53 = vrot.slane %v75_v40, %v836_v6  ;;  %v276_v45 = vld [vmem:[#allocation5 + $0x18] sm:$0xff] }
  0x50   :  { %v456_v54 = vadd.f32 %v344_v46, %v256_v44  ;;  %v556_v55 = vcombine.low %v453_v47, %v454_v48  ;;  %v156_v56 = vrot.slane %v75_v40, %v840_v8  ;;  %v160_v57 = vrot.slane %v75_v40, %v842_v9 }
  0x51   :  { %v555_v59 = vcombine.low %v547_v41, %v554_v50  ;;  %v257_v60 = vmul.f32 %v148_v52, %v853_v18  ;;  %v258_v58 = vmul.f32 %v152_v53, %v866_v26  ;;  %v348_v61 = vrot.slane %v275_v49, %v834_v5 }
  0x52   :  { %v557_v62 = vcombine.low %v455_v51, %v456_v54  ;;  %v564_v63 = vrot.slane %v556_v55, %v838_v7  ;;  %v259_v0 = vmul.f32 %v156_v56, %v862_v25  ;;  %v260_v1 = vmul.f32 %v160_v57, %v876_v33 }
  0x53   :  { %651 = vst [vmem:[#allocation8 + $0x10] sm:$0xff] %v555_v59  ;;  %v352_v2 = vrot.slane %v275_v49, %v836_v6  ;;  %v356_v3 = vrot.slane %v275_v49, %v840_v8  ;;  %v360_v4 = vrot.slane %v275_v49, %v842_v9  ;;  %v457_v11 = vadd.f32 %v348_v61, %v257_v60 }
  0x54   :  { %v571_v12 = vrot.slane %v557_v62, %v838_v7  ;;  %v164_v13 = vrot.slane %v75_v40, %v844_v10  ;;  %v168_v17 = vrot.slane %v75_v40, %v846_v14  ;;  %v172_v19 = vrot.slane %v75_v40, %v848_v15 }
  0x55   :  { %v458_v20 = vadd.f32 %v352_v2, %v258_v58  ;;  %v459_v21 = vadd.f32 %v356_v3, %v259_v0  ;;  %v460_v22 = vadd.f32 %v360_v4, %v260_v1  ;;  %v176_v23 = vrot.slane %v75_v40, %v850_v16 }
  0x56   :  { %v572_v27 = vcombine.low %v564_v63, %v571_v12  ;;  %v261_v28 = vmul.f32 %v164_v13, %v853_v18  ;;  %v262_v29 = vmul.f32 %v168_v17, %v866_v26  ;;  %v263_v30 = vmul.f32 %v172_v19, %v862_v25 }
  0x57   :  { %v573_v31 = vcombine.low %v457_v11, %v458_v20  ;;  %v574_v32 = vcombine.low %v459_v21, %v460_v22  ;;  %v264_v34 = vmul.f32 %v176_v23, %v876_v33  ;;  %v364_v35 = vrot.slane %v275_v49, %v844_v10 }
  0x58   :  { %652 = vst [vmem:[#allocation8 + $0x18] sm:$0xff] %v572_v27  ;;  %v368_v36 = vrot.slane %v275_v49, %v846_v14  ;;  %v372_v37 = vrot.slane %v275_v49, %v848_v15  ;;  %v376_v38 = vrot.slane %v275_v49, %v850_v16  ;;  %v180_v39 = vrot.slane %v76_v24, %v834_v5 }
  0x59   :  { %v581_v40 = vrot.slane %v573_v31, %v838_v7  ;;  %v588_v42 = vrot.slane %v574_v32, %v838_v7  ;;  %v461_v43 = vadd.f32 %v364_v35, %v261_v28  ;;  %v184_v44 = vrot.slane %v76_v24, %v836_v6 }
  0x5a   :  { %v462_v41 = vadd.f32 %v368_v36, %v262_v29  ;;  %v463_v46 = vadd.f32 %v372_v37, %v263_v30  ;;  %v464_v47 = vadd.f32 %v376_v38, %v264_v34  ;;  %v188_v48 = vrot.slane %v76_v24, %v840_v8 }
  0x5b   :  { %v589_v50 = vcombine.low %v581_v40, %v588_v42  ;;  %v192_v51 = vrot.slane %v76_v24, %v842_v9  ;;  %v265_v49 = vmul.f32 %v180_v39, %v853_v18  ;;  %v266_v52 = vmul.f32 %v184_v44, %v866_v26 }
  0x5c   :  { %v590_v53 = vcombine.low %v461_v43, %v462_v41  ;;  %v591_v54 = vcombine.low %v463_v46, %v464_v47  ;;  %v267_v55 = vmul.f32 %v188_v48, %v862_v25  ;;  %v380_v56 = vrot.slane %v276_v45, %v834_v5 }
  0x5d   :  { %653 = vst [vmem:[#allocation8 + $0x20] sm:$0xff] %v589_v50  ;;  %v268_v57 = vmul.f32 %v192_v51, %v876_v33  ;;  %v384_v59 = vrot.slane %v276_v45, %v836_v6  ;;  %v388_v60 = vrot.slane %v276_v45, %v840_v8  ;;  %v392_v58 = vrot.slane %v276_v45, %v842_v9 }
  0x5e   :  { %v598_v61 = vrot.slane %v590_v53, %v838_v7  ;;  %v605_v62 = vrot.slane %v591_v54, %v838_v7  ;;  %v465_v63 = vadd.f32 %v380_v56, %v265_v49  ;;  %v196_v0 = vrot.slane %v76_v24, %v844_v10 }
  0x5f   :  { %v466_v1 = vadd.f32 %v384_v59, %v266_v52  ;;  %v467_v2 = vadd.f32 %v388_v60, %v267_v55  ;;  %v468_v3 = vadd.f32 %v392_v58, %v268_v57  ;;  %v200_v5 = vrot.slane %v76_v24, %v846_v14 }
  0x60   :  { %v606_v4 = vcombine.low %v598_v61, %v605_v62  ;;  %v204_v11 = vrot.slane %v76_v24, %v848_v15  ;;  %v208_v6 = vrot.slane %v76_v24, %v850_v16  ;;  %v269_v8 = vmul.f32 %v196_v0, %v853_v18 }
  0x61   :  { %v607_v9 = vcombine.low %v465_v63, %v466_v1  ;;  %v608_v12 = vcombine.low %v467_v2, %v468_v3  ;;  %v270_v13 = vmul.f32 %v200_v5, %v866_v26  ;;  %v396_v17 = vrot.slane %v276_v45, %v844_v10 }
  0x62   :  { %654 = vst [vmem:[#allocation8 + $0x28] sm:$0xff] %v606_v4  ;;  %v271_v19 = vmul.f32 %v204_v11, %v862_v25  ;;  %v272_v20 = vmul.f32 %v208_v6, %v876_v33  ;;  %v400_v21 = vrot.slane %v276_v45, %v846_v14  ;;  %v404_v22 = vrot.slane %v276_v45, %v848_v15 }
  0x63   :  { %v615_v23 = vrot.slane %v607_v9, %v838_v7  ;;  %v622_v24 = vrot.slane %v608_v12, %v838_v7  ;;  %v408_v18 = vrot.slane %v276_v45, %v850_v16  ;;  %v469_v27 = vadd.f32 %v396_v17, %v269_v8 }
  0x64   :  { %v470_v28 = vadd.f32 %v400_v21, %v270_v13  ;;  %v471_v26 = vadd.f32 %v404_v22, %v271_v19 }
  0x65   :  { %v623_v29 = vcombine.low %v615_v23, %v622_v24  ;;  %v472_v10 = vadd.f32 %v408_v18, %v272_v20 }
  0x66   :  { %v624_v30 = vcombine.low %v469_v27, %v470_v28 }
  0x67   :  { %655 = vst [vmem:[#allocation8 + $0x30] sm:$0xff] %v623_v29  ;;  %v625_v25 = vcombine.low %v471_v26, %v472_v10 }
  0x68   :  { %v632_v33 = vrot.slane %v624_v30, %v838_v7 }
  0x69   :  { %v639_v14 = vrot.slane %v625_v25, %v838_v7 }
  0x6b   :  { %v640_v15 = vcombine.low %v632_v33, %v639_v14 }
  0x6d   :  { %656 = vst [vmem:[#allocation8 + $0x38] sm:$0xff] %v640_v15 }
  0x6e   :  { %756 = shalt.err (!%p753_p0)
}
  0x6f   :  { %s757_s23 = scalar_lea.hbm %s993_s3, 1024 }
  0x70   :  { %p758_p1 = scmp.ne.s32.totalorder %s993_s3, %s757_s23  ;;  %p761_p2 = scmp.lt.u32.totalorder %s757_s23, %s993_s3 }
  0x72   :  { %p763_p3 = pnand %p761_p2, %p758_p1 }
  0x74   :  { %766 = shalt.err (!%p763_p3)
}
  0x75   :  { %666 = dma.vmem_to_hbm [thread:$0]  %s664_s19, 1024, %s993_s3, [#allocation4]  }
  0x76   :  { %771 = dma.done.wait [#allocation4], 1024  }
  0x77   :  { %772 = vsyncadd [#allocation4], 4294966272 }
  0x78   :  { %670 = vsyncpa [#allocation3], 1 }
  0x79   :  { %671 = vsyncpa [#allocation6], 1 }
  0x7a   :  { %672 = vsyncpa [#allocation4], 1 }

</bundles_post_ra>
